<compile_context>
chip_gen: v7x
topology: tpu7x:2x2x1
jax: 0.10.0
libtpu: 0.0.40
codegen_flags: <defaults>
</compile_context>

<pallas_src>
import jax
import jax.numpy as jnp
from jax.experimental import pallas as pl
from jax.experimental.pallas import tpu as pltpu


def _identity_kernel(x_ref, o_ref):
    # Pure VMEM load -> store of the current tile.
    o_ref[...] = x_ref[...]


_TARGET_BLOCK_BYTES = 2 * 1024 * 1024  # ~2 MiB blocks: >85% of HBM roofline on v6e,
                                       # safe on v5e (16 MiB scoped) and v7x (64 MiB VMEM).


def nonorm_forward(x):
    """NoNorm forward: identity. Same shape and dtype as the input."""
    orig_shape = x.shape
    n = x.size
    if n == 0:
        return x  # nothing to copy

    itemsize = jnp.dtype(x.dtype).itemsize
    # Sublane multiple so packed dtypes (bf16 -> 16, int8/fp8 -> 32) avoid masked stores.
    sub = max(8, 32 // max(itemsize, 1))

    flat = x.reshape(-1)

    # Pick a wide, lane-dense column count (multiple of 128), preferring an exact
    # divisor of n so the common case needs no pad and no trailing slice.
    cols = None
    for c in (4096, 2048, 1024, 512, 256, 128):
        if n % c == 0:
            cols = c
            break

    if cols is not None:
        rows = n // cols
        x2d = flat.reshape(rows, cols)
        padded = False
    else:
        # Ragged tail: one pad to a rectangular lane-dense buffer, sliced off afterwards.
        cols = 512
        rows = -(-n // cols)
        x2d = jnp.pad(flat, (0, rows * cols - n)).reshape(rows, cols)
        padded = True

    # Rows per block targeting ~2 MiB, aligned to the dtype's sublane multiple.
    max_tile_rows = max(sub, (_TARGET_BLOCK_BYTES // (cols * itemsize)) // sub * sub)
    if rows <= max_tile_rows:
        tile_rows = rows          # single block == full array dims (always legal)
    else:
        tile_rows = max_tile_rows  # interior blocks aligned; last block may be partial

    grid = (pl.cdiv(rows, tile_rows),)

    out2d = pl.pallas_call(
        _identity_kernel,
        out_shape=jax.ShapeDtypeStruct((rows, cols), x2d.dtype),
        grid_spec=pltpu.PrefetchScalarGridSpec(
            num_scalar_prefetch=0,
            grid=grid,
            in_specs=[pl.BlockSpec((tile_rows, cols), lambda i: (i, 0))],
            out_specs=pl.BlockSpec((tile_rows, cols), lambda i: (i, 0)),
        ),
        compiler_params=pltpu.CompilerParams(
            dimension_semantics=("parallel",)),  # shards the grid across both TCs on v7x
        cost_estimate=pl.CostEstimate(
            flops=0,
            transcendentals=0,
            bytes_accessed=2 * rows * cols * itemsize),
    )(x2d)

    if padded:
        return out2d.reshape(-1)[:n].reshape(orig_shape)
    return out2d.reshape(orig_shape)


if __name__ == "__main__":
    key = jax.random.PRNGKey(0)
    # Small NCHW input consistent with a norm-layer-style module.
    x = jax.random.normal(key, (2, 4, 16, 16), dtype=jnp.float32)

    nonorm = jax.jit(nonorm_forward)
    y = nonorm(x)
    y = jax.block_until_ready(y)

    # Verify identity semantics exactly.
    assert y.shape == x.shape
    assert y.dtype == x.dtype
    assert bool(jnp.all(y == x))

    # Also exercise a ragged (non-128-aligned) size to cover the pad path.
    x2 = jax.random.normal(jax.random.PRNGKey(1), (3, 5, 7), dtype=jnp.float32)
    y2 = jax.block_until_ready(nonorm_forward(x2))
    assert y2.shape == x2.shape and bool(jnp.all(y2 == x2))

    print("KERNEL_OK")
</pallas_src>

<mosaic_0001>
module attributes {stable_mosaic.version = 11 : i64} {
  func.func @_identity_kernel(%arg0: i32, %arg1: memref<1x2048xf32, #tpu.memory_space<vmem>>, %arg2: memref<1x2048xf32, #tpu.memory_space<vmem>>) attributes {dimension_semantics = [#tpu.dimension_semantics<parallel>], iteration_bounds = array<i64: 1>, scalar_prefetch = 0 : i64, scratch_operands = 0 : i64, tpu.core_type = #tpu.core_type<tc>, window_params = [{transform_indices = @transform_0, window_bounds = array<i64: 1, 2048>}, {transform_indices = @transform_1, window_bounds = array<i64: 1, 2048>}]} {
    %c0 = arith.constant 0 : index
    %c0_0 = arith.constant 0 : index
    %0 = vector.load %arg1[%c0, %c0_0] : memref<1x2048xf32, #tpu.memory_space<vmem>>, vector<1x2048xf32>
    %c0_1 = arith.constant 0 : index
    %c0_2 = arith.constant 0 : index
    %1 = vector.load %arg2[%c0_1, %c0_2] : memref<1x2048xf32, #tpu.memory_space<vmem>>, vector<1x2048xf32>
    tpu.vector_store %arg2[%c0_1, %c0_2], %0 {strides = array<i32>} : memref<1x2048xf32, #tpu.memory_space<vmem>>, vector<1x2048xf32>,
    return
  }
  func.func @transform_0(%arg0: i32) -> (i32, i32) {
    %c0_i32 = arith.constant 0 : i32
    %c0_i32_0 = arith.constant 0 : i32
    return %arg0, %c0_i32 : i32, i32
  }
  func.func @transform_1(%arg0: i32) -> (i32, i32) {
    %c0_i32 = arith.constant 0 : i32
    %c0_i32_0 = arith.constant 0 : i32
    return %arg0, %c0_i32 : i32, i32
  }
}

</mosaic_0001>

<bundles_post_ra>
// kernel: nonorm_forward.1
= control target key start
LH: loop header
LB: loop body
LE: loop exit
PB: predicated region body
PF: predicated region fallthrough
CT: control target
= control target key end

     0   :  { %s38_s0 = inlined_call_operand.vmem [shape: f32[1,2048], index: 0, kind: input, shape index: {}]   ;;  %s39_s1 = inlined_call_operand.vmem [shape: f32[1,2048], index: 1, kind: output, shape index: {}]  }
   0x1   :  { %v8_v0 = vld [vmem:[%s38_s0] sm:$0xff]  ;;  %v9_v1 = vld [vmem:[%s38_s0 + $0x8] sm:$0xff] }
   0x2   :  { %10 = vst [vmem:[%s39_s1] sm:$0xff] %v8_v0  ;;  %11 = vst [vmem:[%s39_s1 + $0x8] sm:$0xff] %v9_v1 }

</bundles_post_ra>
